<compile_context>
chip_gen: v7x
topology: tpu7x:2x2x1
jax: 0.10.0
libtpu: 0.0.40
codegen_flags: <defaults>
</compile_context>

<pallas_src>
import math

import jax
import jax.numpy as jnp
from jax.experimental import pallas as pl
from jax.experimental.pallas import tpu as pltpu


def _repeat_kernel(x_ref, o_ref):
    # x_ref: (TILE_R, LANE) input tile (stays VMEM-resident across inner T).
    # o_ref: (TILE_R, LANE) output tile for the current (row_tile, t) point
    #        (leading T dim squeezed away by pl.Squeezed()).
    o_ref[...] = x_ref[...]


def ms_get_t(x: jnp.ndarray, T: int = 4, *,
             buffer_budget_bytes: int = 8 * 1024 * 1024,
             min_pallas_bytes: int = 1 << 20) -> jnp.ndarray:
    """Replicate x along a new leading time axis T times (Pallas TPU kernel)."""
    orig_shape = x.shape
    n = math.prod(orig_shape)
    itemsize = jnp.dtype(x.dtype).itemsize

    # Lane width: largest of 512/256/128 that divides n (keeps every store a
    # full-width unmasked vst and avoids any wrapper pad/slice copies).
    lane = next((l for l in (512, 256, 128) if n % l == 0), None)

    # Tiny inputs (pure fixed overhead) or ragged sizes -> plain XLA broadcast.
    # TODO(synk): ragged tails (n % 128 != 0) are handled by XLA broadcast
    # instead of an in-kernel masked final block.
    if lane is None or n * itemsize < min_pallas_bytes:
        return jnp.broadcast_to(x[None], (T,) + orig_shape)

    rows = n // lane

    # Byte-based, dtype-aware tile sizing (~8 MiB per buffer, capped so the
    # 4-buffer footprint stays well inside v7x's 64 MiB VMEM).
    buffer_budget_bytes = min(buffer_budget_bytes, 12 * 1024 * 1024)
    sublane = max(8, 32 // itemsize)          # 8 f32, 16 bf16, 32 int8/fp8
    tile_r = buffer_budget_bytes // (lane * itemsize)
    tile_r = max(sublane, (tile_r // sublane) * sublane)
    if tile_r >= rows:
        tile_r = rows                          # full extent (OK even if < 8)
    num_row_tiles = pl.cdiv(rows, tile_r)

    tile_bytes = tile_r * lane * itemsize
    # 2 input + 2 output double buffers, plus margin for Mosaic scratch.
    vmem_limit = min(4 * tile_bytes + (8 << 20), 56 << 20)

    x2d = x.reshape(rows, lane)

    out = pl.pallas_call(
        _repeat_kernel,
        out_shape=jax.ShapeDtypeStruct((T, rows, lane), x.dtype),
        grid_spec=pltpu.PrefetchScalarGridSpec(
            num_scalar_prefetch=0,
            # T innermost: the input block index is constant across it, so the
            # input tile is read from HBM once per row tile and written T times.
            grid=(num_row_tiles, T),
            in_specs=[
                pl.BlockSpec((tile_r, lane), lambda r, t: (r, 0)),
            ],
            out_specs=pl.BlockSpec(
                (pl.Squeezed(), tile_r, lane), lambda r, t: (t, r, 0)
            ),
        ),
        compiler_params=pltpu.CompilerParams(
            dimension_semantics=("parallel", "arbitrary"),
            vmem_limit_bytes=vmem_limit,
        ),
    )(x2d)

    return out.reshape((T,) + orig_shape)


if __name__ == "__main__":
    key = jax.random.PRNGKey(0)
    B, C, H, W = 2, 4, 16, 16
    T = 4
    x = jax.random.normal(key, (B, C, H, W), dtype=jnp.float32)

    # Reference: pure-JAX equivalent of unsqueeze(0).repeat(T,1,1,1,1).
    y_ref = jnp.broadcast_to(x[None], (T, B, C, H, W))

    # Force the Pallas path (the test input is below the tiny-input bypass).
    y = ms_get_t(x, T=T, min_pallas_bytes=0)
    y = jax.block_until_ready(y)
    assert y.shape == (T, B, C, H, W), y.shape
    assert jnp.array_equal(y, y_ref), "mismatch vs reference (pallas path)"

    # Default path (tiny-input XLA bypass) must also be correct.
    y2 = jax.block_until_ready(ms_get_t(x, T=T))
    assert jnp.array_equal(y2, y_ref), "mismatch vs reference (fallback path)"

    print("KERNEL_OK")
</pallas_src>

<mosaic_0001>
module attributes {stable_mosaic.version = 11 : i64} {
  func.func @_repeat_kernel(%arg0: i32, %arg1: i32, %arg2: memref<4x512xf32, #tpu.memory_space<vmem>>, %arg3: memref<1x4x512xf32, #tpu.memory_space<vmem>>) attributes {dimension_semantics = [#tpu.dimension_semantics<parallel>, #tpu.dimension_semantics<arbitrary>], iteration_bounds = array<i64: 1, 4>, scalar_prefetch = 0 : i64, scratch_operands = 0 : i64, tpu.core_type = #tpu.core_type<tc>, window_params = [{transform_indices = @transform_0, window_bounds = array<i64: 4, 512>}, {transform_indices = @transform_1, window_bounds = array<i64: 1, 4, 512>}]} {
    %c0 = arith.constant 0 : index
    %c0_0 = arith.constant 0 : index
    %0 = vector.load %arg2[%c0, %c0_0] : memref<4x512xf32, #tpu.memory_space<vmem>>, vector<4x512xf32>
    %c0_1 = arith.constant 0 : index
    %c0_2 = arith.constant 0 : index
    %c0_3 = arith.constant 0 : index
    %1 = vector.load %arg3[%c0_1, %c0_2, %c0_3] : memref<1x4x512xf32, #tpu.memory_space<vmem>>, vector<1x4x512xf32>
    %2 = vector.shape_cast %1 : vector<1x4x512xf32> to vector<4x512xf32>
    %3 = vector.shape_cast %0 : vector<4x512xf32> to vector<1x4x512xf32>
    tpu.vector_store %arg3[%c0_1, %c0_2, %c0_3], %3 {strides = array<i32>} : memref<1x4x512xf32, #tpu.memory_space<vmem>>, vector<1x4x512xf32>,
    return
  }
  func.func @transform_0(%arg0: i32, %arg1: i32) -> (i32, i32) {
    %c0_i32 = arith.constant 0 : i32
    %c0_i32_0 = arith.constant 0 : i32
    return %arg0, %c0_i32 : i32, i32
  }
  func.func @transform_1(%arg0: i32, %arg1: i32) -> (i32, i32, i32) {
    %c0_i32 = arith.constant 0 : i32
    %c0_i32_0 = arith.constant 0 : i32
    return %arg1, %arg0, %c0_i32 : i32, i32, i32
  }
}

</mosaic_0001>

<bundles_post_ra>
// kernel: tpu_custom_call.1
= control target key start
LH: loop header
LB: loop body
LE: loop exit
PB: predicated region body
PF: predicated region fallthrough
CT: control target
= control target key end

     0   :  { %6 = vsyncpa [#allocation3], 0  ;;  %s571_s0 = inlined_call_operand.hbm [shape: f32[4,512], index: 0, kind: input, shape index: {}]   ;;  %s572_s1 = inlined_call_operand.hbm [shape: f32[4,4,512], index: 1, kind: output, shape index: {}]  }
   0x1   :  { %7 = vsyncpa [#allocation4], 0 }
   0x2   :  { %9 = vsyncpa [#allocation4 + $0x1], 0  ;;  %s426_s6 = smov 0   ;;  %s428_s7 = smov 0  }
   0x3   :  { %s430_s8 = smov 0   ;;  %s432_s9 = smov 0  }
   0x4   :  { %s434_s10 = smov 0   ;;  %s436_s11 = smov 0  }
   0x5 LB: > { %s223_s12 = sadd.s32 4294967295, %s412_s11   ;;  %s224_s13 = sadd.s32 4294967294, %s412_s11   ;;  %s412_s11 = sphi %s436_s11, %s15_s11   ;;  %s408_s10 = sphi %s434_s10, %s590_s10   ;;  %s404_s9 = sphi %s432_s9, %s589_s9   ;;  %s400_s8 = sphi %s430_s8, %s588_s8   ;;  %s396_s7 = sphi %s428_s7, %s587_s7   ;;  %s392_s6 = sphi %s426_s6, %s586_s6  }
   0x6   : > { %s24_s14 = sadd.s32 1, %s408_s10  ;;  %s62_s15 = sadd.s32 1, %s400_s8 }
   0x7   : > { %p25_p0 = scmp.ge.s32.totalorder %s24_s14, 4  ;;  %p72_p1 = scmp.ne.s32.totalorder %s400_s8, %s396_s7 }
   0x8   : > { %p73_p2 = scmp.eq.s32.totalorder %s223_s12, 3  ;;  %p78_p3 = scmp.ne.s32.totalorder %s396_s7, %s392_s6 }
   0x9   : > { %s592_s14 = smov (%p25_p0, %s24_s14), 0  ;;  %p79_p5 = scmp.eq.s32.totalorder %s224_s13, 3 }
   0xa   : > { %p466_p4 = por %p73_p2, %p72_p1  ;;  %s57_s17 = ssub.s32 %s408_s10, %s592_s14 }
   0xb   : > { %p225_p6 = scmp.ge.s32.totalorder %s412_s11, 1  ;;  %p60_p7 = scmp.eq.s32.totalorder %s57_s17, 0 }
   0xc   : > { %s577_s16 = scalar_select %p466_p4, 1, 0 }
   0xd   : > { %p473_p8 = por %p79_p5, %p78_p3  ;;  %p86_p9 = scmp.lt.s32.totalorder %s412_s11, 5 }
   0xe   : > { %s479_s19 = scalar_select %p60_p7, %s400_s8, %s62_s15  }
   0xf   : > { %s578_s18 = scalar_select %p473_p8, 1, 0 }
  0x10   : > { %p481_p10 = pnand %p225_p6, %p86_p9  ;;  %p485_p11 = scmp.eq.s32.totalorder %s223_s12, 0 }
  0x11   : > { %s414_s22 = smov [#allocation2]   ;;  %s302_s27 = scalar_lea.hbm %s571_s0, 256 }
  0x12   : > { %s579_s20 = scalar_select %p481_p10, 1, 0 }
  0x13   : > { %s580_s21 = scalar_select %p485_p11, 1, 0 }
  0x14   : > { %p242_p12 = pneg %p481_p10  ;;  %s102_s23 = sshll.u32 %s414_s22, 4  ;;  %s103_s23 = int_to_ptr.vmem [resolvable:$true] %s102_s23 }
  0x15   : > { %p303_p0 = scmp.ne.s32.totalorder %s571_s0, %s302_s27  ;;  %p309_p5 = scmp.lt.u32.totalorder %s302_s27, %s571_s0 }
  0x16   : > { %p493_p13 = pnand %p485_p11, %p242_p12 }
  0x18   : > { %p304_p1 = pneg %p493_p13 }
  0x1a   : > { %p305_p2 = pnand %p304_p1, %p303_p0 }
  0x1c   : > { %p306_p3 = pneg %p305_p2 }
  0x1e   : > { %p311_p6 = pnand %p309_p5, %p306_p3 }
  0x20   : > { %314 = shalt.err (!%p311_p6)
}
  0x21   : > { %s315_s3 = scalar_lea.vmem %s103_s23, 256  ;;  %p323_p8 = scmp.lt.s32.totalorder %s103_s23, %s103_s23 }
  0x22   : > { %p316_p7 = scmp.ne.s32.totalorder %s103_s23, %s315_s3  ;;  %p324_p4 = scmp.lt.s32.totalorder %s315_s3, %s315_s3 }
  0x24   : > { %p318_p9 = pnand %p316_p7, %p304_p1  ;;  %p325_p11 = por %p324_p4, %p323_p8 }
  0x26   : > { %p319_p12 = pneg %p318_p9 }
  0x28   : > { %p326_p10 = pnand %p325_p11, %p319_p12 }
  0x2a   : > { %329 = shalt.err (!%p326_p10)
}
  0x2b   : > { %245 = dma.hbm_to_vmem [thread:$0]  (!%p493_p13), %s571_s0, 256, %s103_s23, [#allocation3]  }
  0x2c   : > { %p582_p0 = scmp.ne.s32.totalorder %s579_s20, 0 }
  0x2d   : > { %p583_p2 = scmp.ne.s32.totalorder (!%p582_p0), %s580_s21, 0 }
  0x2e   : > { %115 = sbr.rel (%p582_p0) target bundleno = 80 (0x50), region = 24 }
  0x35   : > { %383 = dma.done.wait (%p583_p2), [#allocation3], 256  }
  0x36   : > { %385 = vsyncadd (%p583_p2), [#allocation3], 4294967040  ;;  %s127_s12 = sand.u32 1, %s396_s7   ;;  %s235_s22 = sshll.u32 %s404_s9, 8  ;;  %v130_v0 = vld [vmem:[#allocation2] sm:$0xff]  ;;  %v131_v1 = vld [vmem:[#allocation2 + $0x8] sm:$0xff] }
  0x37   : > { %s229_s13 = sshll.u32 %s127_s12, 4  ;;  %s526_s20 = scalar_lea.hbm %s572_s1, %s235_s22 }
  0x38   : > { %s129_s15 = scalar_lea.vmem [#allocation5], %s229_s13  ;;  %s135_s21 = scalar_lea.sflag [#allocation4], %s127_s12 }
  0x39   : > { %s151_s17 = sshll.u32 %s129_s15, 4  ;;  %132 = vst [vmem:[%s129_s15] sm:$0xff] %v130_v0  ;;  %133 = vst [vmem:[%s129_s15 + $0x8] sm:$0xff] %v131_v1  ;;  %p584_p8 = scmp.ne.s32.totalorder %s577_s16, 0  ;;  %s521_s17 = int_to_ptr.vmem [resolvable:$true] %s151_s17 }
  0x3a   : > { %s330_s25 = scalar_lea.vmem %s521_s17, 256  ;;  %s415_s9 = smov [#allocation5]  }
  0x3b   : > { %p331_p4 = scmp.ne.s32.totalorder %s521_s17, %s330_s25  ;;  %s334_s26 = sshll.u32 %s415_s9, 4  ;;  %s335_s26 = int_to_ptr.vmem [resolvable:$false] %s334_s26 }
  0x3c   : > { %s336_s27 = scalar_lea.vmem %s335_s26, 512  ;;  %p337_p13 = scmp.lt.s32.totalorder %s521_s17, %s335_s26 }
  0x3d   : > { %p332_p10 = pnand %p331_p4, %p584_p8  ;;  %p338_p1 = scmp.lt.s32.totalorder %s336_s27, %s330_s25 }
  0x3f   : > { %p333_p11 = pneg %p332_p10  ;;  %p339_p3 = por %p338_p1, %p337_p13 }
  0x41   : > { %p340_p5 = pnand %p339_p3, %p333_p11 }
  0x43   : > { %343 = shalt.err (!%p340_p5)
}
  0x44   : > { %s344_s28 = scalar_lea.hbm %s526_s20, 256  ;;  %s348_s2 = scalar_lea.hbm %s572_s1, 1024 }
  0x45   : > { %p345_p6 = scmp.ne.s32.totalorder %s526_s20, %s344_s28  ;;  %p349_p12 = scmp.lt.u32.totalorder %s526_s20, %s572_s1 }
  0x46   : > { %p350_p0 = scmp.lt.u32.totalorder %s348_s2, %s344_s28  ;;  %p352_p4 = scmp.lt.u32.totalorder %s344_s28, %s526_s20 }
  0x47   : > { %p346_p7 = pnand %p345_p6, %p584_p8 }
  0x48   : > { %p351_p2 = por %p350_p0, %p349_p12 }
  0x49   : > { %p347_p9 = pneg %p346_p7 }
  0x4a   : > { %p353_p10 = por %p352_p4, %p351_p2 }
  0x4c   : > { %p354_p11 = pnand %p353_p10, %p347_p9 }
  0x4e   : > { %357 = shalt.err (!%p354_p11)
}
  0x4f   : > { %240 = dma.vmem_to_hbm [thread:$0]  (%p584_p8), %s521_s17, 256, %s526_s20, %s135_s21  }
  0x50 PF: > { %p252_p13 = scmp.ge.s32.totalorder %s412_s11, 2  ;;  %s163_s5 = sand.u32 1, %s392_s6  }
  0x51   : > { %p585_p1 = scmp.ne.s32.totalorder %s578_s18, 0  ;;  %s164_s12 = scalar_lea.sflag [#allocation4], %s163_s5 }
  0x53   : > { %p247_p3 = pnand %p252_p13, %p585_p1 }
  0x55   : > { %387 = dma.done.wait (!%p247_p3), %s164_s12, 256  }
  0x56   : > { %389 = vsyncadd (!%p247_p3), %s164_s12, 4294967040  ;;  %s15_s11 = sadd.s32 1, %s412_s11   ;;  %s586_s6 = smov %s396_s7 }
  0x57   : > { %p12_p5 = scmp.ge.s32.totalorder %s15_s11, 6   ;;  %s587_s7 = smov %s400_s8 }
  0x58   : > { %s588_s8 = smov %s479_s19  ;;  %s589_s9 = smov %s408_s10 }
  0x59   : > { %s590_s10 = smov %s592_s14  ;;  %14 = sbr.rel (!%p12_p5) target bundleno = 5 (0x5), region = 62 }
  0x60   :  { %169 = vsyncpa [#allocation3], 1 }
  0x61   :  { %171 = vsyncpa [#allocation3 + $0x1], 1 }
  0x62   :  { %172 = vsyncpa [#allocation4], 1 }
  0x63   :  { %174 = vsyncpa [#allocation4 + $0x1], 1 }

</bundles_post_ra>
